<compile_context>
chip_gen: v5e
topology: v5e:2x2
jax: 0.10.0
libtpu: 0.0.40
codegen_flags: <defaults>
</compile_context>

<pallas_src>
from functools import partial

import jax
import jax.numpy as jnp
from jax.experimental import pallas as pl
from jax.experimental.pallas import tpu as pltpu


def iln_kernel(x_ref, rho_ref, gamma_ref, beta_ref, o_ref, *, eps, c, h, w):
    f32 = jnp.float32
    # x block: (1, C, H, W) in the input dtype.  No full f32 materialization:
    # sums accumulate in f32 (dtype=), diffs promote elementwise inside the
    # fused passes.
    x = x_ref[0]  # (C, H, W), io dtype

    inv_h, inv_w, inv_c = 1.0 / h, 1.0 / w, 1.0 / c
    inv_hm1, inv_wm1, inv_cm1 = 1.0 / (h - 1), 1.0 / (w - 1), 1.0 / (c - 1)

    # ---- shared stage-1 reduction over H (axis 1) ---------------------------
    row_mean = jnp.sum(x, axis=1, keepdims=True, dtype=f32) * inv_h        # (C,1,W)
    d_h = x - row_mean                                                      # f32 by promotion
    var_h = jnp.sum(d_h * d_h, axis=1, keepdims=True) * inv_hm1            # (C,1,W)

    # ---- instance statistics (per channel) ----------------------------------
    in_mean = jnp.sum(row_mean, axis=2, keepdims=True) * inv_w              # (C,1,1)
    vh_mean = jnp.sum(var_h, axis=2, keepdims=True) * inv_w                 # (C,1,1)
    d_vh = var_h - vh_mean
    in_var = jnp.sum(d_vh * d_vh, axis=2, keepdims=True) * inv_wm1          # (C,1,1)

    # ---- layer statistics (per sample) ---------------------------------------
    ch_mean = jnp.sum(x, axis=0, keepdims=True, dtype=f32) * inv_c          # (1,H,W)
    d_c = x - ch_mean
    var_c = jnp.sum(d_c * d_c, axis=0, keepdims=True) * inv_cm1             # (1,H,W)
    vc_hmean = jnp.sum(var_c, axis=1, keepdims=True) * inv_h                # (1,1,W)
    d_vc = var_c - vc_hmean
    var_ch = jnp.sum(d_vc * d_vc, axis=1, keepdims=True) * inv_hm1          # (1,1,W)
    vch_mean = jnp.sum(var_ch, axis=2, keepdims=True) * inv_w               # (1,1,1)
    d_vch = var_ch - vch_mean
    ln_var = jnp.sum(d_vch * d_vch, axis=2, keepdims=True) * inv_wm1        # (1,1,1)
    ln_mean = jnp.sum(in_mean, axis=0, keepdims=True) * inv_c               # (1,1,1)

    # ---- fold IN + LN + affine into one per-channel scale / shift ------------
    # out = gamma*(rho*(x-in_mean)*inv_in + (1-rho)*(x-ln_mean)*inv_ln) + beta
    #     = x * scale + shift
    rho = rho_ref[...].astype(f32)      # (C,1,1)
    gamma = gamma_ref[...].astype(f32)  # (C,1,1)
    beta = beta_ref[...].astype(f32)    # (C,1,1)

    inv_in = jax.lax.rsqrt(in_var + eps)  # (C,1,1) -> EUP, tiny
    inv_ln = jax.lax.rsqrt(ln_var + eps)  # (1,1,1)
    a = rho * inv_in
    b = (1.0 - rho) * inv_ln
    scale = gamma * (a + b)                                  # (C,1,1)
    shift = beta - gamma * (a * in_mean + b * ln_mean)       # (C,1,1)

    # Single fused apply pass over the tile; no large temporaries.
    o_ref[0] = (x * scale + shift).astype(o_ref.dtype)


def _vmem_capacity_bytes():
    """Physical VMEM per core: 128 MiB on v5e/v6e, 64 MiB on v7x."""
    try:
        return int(pltpu.get_tpu_info().vmem_capacity_bytes)
    except Exception:
        # Query unavailable: assume the smallest current generation (v7x).
        return 64 * 1024 * 1024


def iln_forward(x, rho, gamma, beta, eps=1e-5):
    N, C, H, W = x.shape
    # ddof=1 at every var stage (as in the PyTorch source) divides by zero if
    # any reduced dim is 1 — assert rather than silently produce inf/nan.
    assert C > 1 and H > 1 and W > 1, "ILN var-of-var (ddof=1) needs C, H, W > 1"

    # Params arrive as (1, C, 1, 1); drop the leading unit dim (free reshape).
    # NOTE: per-channel scalars in an NCHW-blocked kernel unavoidably live one
    # per (8,128) tile (C*4 KiB each); that cost is included in the VMEM
    # estimate below.  A lane-dense (1, C) form only pays off in the deferred
    # NHWC / flat-layout variant (see header TODO).
    rho3 = rho.reshape(C, 1, 1)
    gamma3 = gamma.reshape(C, 1, 1)
    beta3 = beta.reshape(C, 1, 1)

    kernel = partial(iln_kernel, eps=eps, c=C, h=H, w=W)
    x_spec = pl.BlockSpec((1, C, H, W), lambda n: (n, 0, 0, 0))
    param_spec = pl.BlockSpec((C, 1, 1), lambda n: (0, 0, 0))

    # ---- scoped-VMEM budget (per generation) ---------------------------------
    # Working set: double-buffered in + out blocks (io dtype) + ~3 full-size f32
    # transients (diff / square live across a reduction, plus the apply) +
    # ~12 padded per-channel (C,1,1) scalars + slack.
    io_bytes = C * H * W * x.dtype.itemsize
    f32_block = C * H * W * 4
    est = 4 * io_bytes + 3 * f32_block + 12 * C * 4096 + (2 << 20)
    cap = _vmem_capacity_bytes()
    vmem_limit = int(min(max(est, 32 * 1024 * 1024), int(cap * 0.85)))
    # TODO(synk): if est > 0.85*cap (very large C*H*W, mainly v7x), switch to the
    # H-tiled streaming-stats + apply two-kernel variant instead of clamping.

    return pl.pallas_call(
        kernel,
        out_shape=jax.ShapeDtypeStruct((N, C, H, W), x.dtype),
        grid_spec=pl.GridSpec(
            grid=(N,),
            in_specs=[x_spec, param_spec, param_spec, param_spec],
            out_specs=pl.BlockSpec((1, C, H, W), lambda n: (n, 0, 0, 0)),
        ),
        compiler_params=pltpu.CompilerParams(
            dimension_semantics=("parallel",),
            vmem_limit_bytes=vmem_limit,
        ),
    )(x, rho3, gamma3, beta3)


def iln_reference(x, rho, gamma, beta, eps=1e-5):
    """Pure-JAX reference matching the PyTorch forward exactly (keep f32 even
    when validating low-precision kernel inputs)."""
    x = x.astype(jnp.float32)

    def var(v, axis):
        return jnp.var(v, axis=axis, keepdims=True, ddof=1)

    in_mean = jnp.mean(x, axis=(2, 3), keepdims=True)
    in_var = var(var(x, 2), 3)
    out_in = (x - in_mean) / jnp.sqrt(in_var + eps)

    ln_mean = jnp.mean(x, axis=(1, 2, 3), keepdims=True)
    ln_var = var(var(var(x, 1), 2), 3)
    out_ln = (x - ln_mean) / jnp.sqrt(ln_var + eps)

    out = rho * out_in + (1.0 - rho) * out_ln
    return out * gamma + beta


if __name__ == "__main__":
    N, C, H, W = 2, 4, 16, 16
    key = jax.random.PRNGKey(0)
    x = jax.random.normal(key, (N, C, H, W), dtype=jnp.float32)

    # Parameters: shapes per ILN.__init__ — (1, num_features, 1, 1).
    # __init__ fills rho=0, gamma=1, beta=0; use deterministic non-trivial
    # values so both the IN and LN branches are actually exercised.
    rho = jnp.linspace(0.1, 0.9, C, dtype=jnp.float32).reshape(1, C, 1, 1)
    gamma = jnp.linspace(0.8, 1.2, C, dtype=jnp.float32).reshape(1, C, 1, 1)
    beta = jnp.linspace(-0.1, 0.1, C, dtype=jnp.float32).reshape(1, C, 1, 1)

    out = jax.block_until_ready(iln_forward(x, rho, gamma, beta))
    ref = iln_reference(x, rho, gamma, beta)

    assert out.shape == (N, C, H, W)
    err = jnp.max(jnp.abs(out - ref))
    assert jnp.allclose(out, ref, atol=2e-5, rtol=2e-5), f"mismatch vs reference, max abs err={err}"
    print("KERNEL_OK")
</pallas_src>

<mosaic_0001>
module attributes {stable_mosaic.version = 11 : i64} {
  func.func @iln_kernel(%arg0: i32, %arg1: memref<1x4x16x16xf32, #tpu.memory_space<vmem>>, %arg2: memref<4x1x1xf32, #tpu.memory_space<vmem>>, %arg3: memref<4x1x1xf32, #tpu.memory_space<vmem>>, %arg4: memref<4x1x1xf32, #tpu.memory_space<vmem>>, %arg5: memref<1x4x16x16xf32, #tpu.memory_space<vmem>>) attributes {dimension_semantics = [#tpu.dimension_semantics<parallel>], iteration_bounds = array<i64: 2>, scalar_prefetch = 0 : i64, scratch_operands = 0 : i64, tpu.core_type = #tpu.core_type<tc>, window_params = [{transform_indices = @transform_0, window_bounds = array<i64: 1, 4, 16, 16>}, {pipeline_mode = #tpu.pipeline_mode<synchronous>, transform_indices = @transform_1, window_bounds = array<i64: 4, 1, 1>}, {pipeline_mode = #tpu.pipeline_mode<synchronous>, transform_indices = @transform_2, window_bounds = array<i64: 4, 1, 1>}, {pipeline_mode = #tpu.pipeline_mode<synchronous>, transform_indices = @transform_3, window_bounds = array<i64: 4, 1, 1>}, {transform_indices = @transform_4, window_bounds = array<i64: 1, 4, 16, 16>}]} {
    %c0 = arith.constant 0 : index
    %c0_0 = arith.constant 0 : index
    %c0_1 = arith.constant 0 : index
    %c0_2 = arith.constant 0 : index
    %0 = vector.load %arg1[%c0, %c0_0, %c0_1, %c0_2] : memref<1x4x16x16xf32, #tpu.memory_space<vmem>>, vector<1x4x16x16xf32>
    %1 = vector.shape_cast %0 : vector<1x4x16x16xf32> to vector<4x16x16xf32>
    %cst = arith.constant dense<0.000000e+00> : vector<4x16xf32>
    %2 = vector.multi_reduction <add>, %1, %cst [1] : vector<4x16x16xf32> to vector<4x16xf32>
    %3 = vector.shape_cast %2 : vector<4x16xf32> to vector<4x1x16xf32>
    %cst_3 = arith.constant 6.250000e-02 : f32
    %4 = vector.broadcast %cst_3 : f32 to vector<4x1x16xf32>
    %5 = arith.mulf %3, %4 : vector<4x1x16xf32>
    %6 = vector.broadcast %5 : vector<4x1x16xf32> to vector<4x16x16xf32>
    %7 = arith.subf %1, %6 : vector<4x16x16xf32>
    %8 = arith.mulf %7, %7 : vector<4x16x16xf32>
    %cst_4 = arith.constant dense<0.000000e+00> : vector<4x16xf32>
    %9 = vector.multi_reduction <add>, %8, %cst_4 [1] : vector<4x16x16xf32> to vector<4x16xf32>
    %10 = vector.shape_cast %9 : vector<4x16xf32> to vector<4x1x16xf32>
    %cst_5 = arith.constant 0.0666666701 : f32
    %11 = vector.broadcast %cst_5 : f32 to vector<4x1x16xf32>
    %12 = arith.mulf %10, %11 : vector<4x1x16xf32>
    %cst_6 = arith.constant dense<0.000000e+00> : vector<4x1xf32>
    %13 = vector.multi_reduction <add>, %5, %cst_6 [2] : vector<4x1x16xf32> to vector<4x1xf32>
    %14 = vector.shape_cast %13 : vector<4x1xf32> to vector<4x1x1xf32>
    %cst_7 = arith.constant 6.250000e-02 : f32
    %15 = vector.broadcast %cst_7 : f32 to vector<4x1x1xf32>
    %16 = arith.mulf %14, %15 : vector<4x1x1xf32>
    %cst_8 = arith.constant dense<0.000000e+00> : vector<4x1xf32>
    %17 = vector.multi_reduction <add>, %12, %cst_8 [2] : vector<4x1x16xf32> to vector<4x1xf32>
    %18 = vector.shape_cast %17 : vector<4x1xf32> to vector<4x1x1xf32>
    %cst_9 = arith.constant 6.250000e-02 : f32
    %19 = vector.broadcast %cst_9 : f32 to vector<4x1x1xf32>
    %20 = arith.mulf %18, %19 : vector<4x1x1xf32>
    %21 = vector.broadcast %20 : vector<4x1x1xf32> to vector<4x1x16xf32>
    %22 = arith.subf %12, %21 : vector<4x1x16xf32>
    %23 = arith.mulf %22, %22 : vector<4x1x16xf32>
    %cst_10 = arith.constant dense<0.000000e+00> : vector<4x1xf32>
    %24 = vector.multi_reduction <add>, %23, %cst_10 [2] : vector<4x1x16xf32> to vector<4x1xf32>
    %25 = vector.shape_cast %24 : vector<4x1xf32> to vector<4x1x1xf32>
    %cst_11 = arith.constant 0.0666666701 : f32
    %26 = vector.broadcast %cst_11 : f32 to vector<4x1x1xf32>
    %27 = arith.mulf %25, %26 : vector<4x1x1xf32>
    %cst_12 = arith.constant dense<0.000000e+00> : vector<16x16xf32>
    %28 = vector.multi_reduction <add>, %1, %cst_12 [0] : vector<4x16x16xf32> to vector<16x16xf32>
    %29 = vector.shape_cast %28 : vector<16x16xf32> to vector<1x16x16xf32>
    %cst_13 = arith.constant 2.500000e-01 : f32
    %30 = vector.broadcast %cst_13 : f32 to vector<1x16x16xf32>
    %31 = arith.mulf %29, %30 : vector<1x16x16xf32>
    %32 = vector.broadcast %31 : vector<1x16x16xf32> to vector<4x16x16xf32>
    %33 = arith.subf %1, %32 : vector<4x16x16xf32>
    %34 = arith.mulf %33, %33 : vector<4x16x16xf32>
    %cst_14 = arith.constant dense<0.000000e+00> : vector<16x16xf32>
    %35 = vector.multi_reduction <add>, %34, %cst_14 [0] : vector<4x16x16xf32> to vector<16x16xf32>
    %36 = vector.shape_cast %35 : vector<16x16xf32> to vector<1x16x16xf32>
    %cst_15 = arith.constant 0.333333343 : f32
    %37 = vector.broadcast %cst_15 : f32 to vector<1x16x16xf32>
    %38 = arith.mulf %36, %37 : vector<1x16x16xf32>
    %cst_16 = arith.constant dense<0.000000e+00> : vector<1x16xf32>
    %39 = vector.multi_reduction <add>, %38, %cst_16 [1] : vector<1x16x16xf32> to vector<1x16xf32>
    %40 = vector.shape_cast %39 : vector<1x16xf32> to vector<1x1x16xf32>
    %cst_17 = arith.constant 6.250000e-02 : f32
    %41 = vector.broadcast %cst_17 : f32 to vector<1x1x16xf32>
    %42 = arith.mulf %40, %41 : vector<1x1x16xf32>
    %43 = vector.broadcast %42 : vector<1x1x16xf32> to vector<1x16x16xf32>
    %44 = arith.subf %38, %43 : vector<1x16x16xf32>
    %45 = arith.mulf %44, %44 : vector<1x16x16xf32>
    %cst_18 = arith.constant dense<0.000000e+00> : vector<1x16xf32>
    %46 = vector.multi_reduction <add>, %45, %cst_18 [1] : vector<1x16x16xf32> to vector<1x16xf32>
    %47 = vector.shape_cast %46 : vector<1x16xf32> to vector<1x1x16xf32>
    %cst_19 = arith.constant 0.0666666701 : f32
    %48 = vector.broadcast %cst_19 : f32 to vector<1x1x16xf32>
    %49 = arith.mulf %47, %48 : vector<1x1x16xf32>
    %cst_20 = arith.constant dense<0.000000e+00> : vector<1x1xf32>
    %50 = vector.multi_reduction <add>, %49, %cst_20 [2] : vector<1x1x16xf32> to vector<1x1xf32>
    %51 = vector.shape_cast %50 : vector<1x1xf32> to vector<1x1x1xf32>
    %cst_21 = arith.constant 6.250000e-02 : f32
    %52 = vector.broadcast %cst_21 : f32 to vector<1x1x1xf32>
    %53 = arith.mulf %51, %52 : vector<1x1x1xf32>
    %54 = vector.broadcast %53 : vector<1x1x1xf32> to vector<1x1x16xf32>
    %55 = arith.subf %49, %54 : vector<1x1x16xf32>
    %56 = arith.mulf %55, %55 : vector<1x1x16xf32>
    %cst_22 = arith.constant dense<0.000000e+00> : vector<1x1xf32>
    %57 = vector.multi_reduction <add>, %56, %cst_22 [2] : vector<1x1x16xf32> to vector<1x1xf32>
    %58 = vector.shape_cast %57 : vector<1x1xf32> to vector<1x1x1xf32>
    %cst_23 = arith.constant 0.0666666701 : f32
    %59 = vector.broadcast %cst_23 : f32 to vector<1x1x1xf32>
    %60 = arith.mulf %58, %59 : vector<1x1x1xf32>
    %cst_24 = arith.constant dense<0.000000e+00> : vector<1x1xf32>
    %61 = vector.multi_reduction <add>, %16, %cst_24 [0] : vector<4x1x1xf32> to vector<1x1xf32>
    %62 = vector.shape_cast %61 : vector<1x1xf32> to vector<1x1x1xf32>
    %cst_25 = arith.constant 2.500000e-01 : f32
    %63 = vector.broadcast %cst_25 : f32 to vector<1x1x1xf32>
    %64 = arith.mulf %62, %63 : vector<1x1x1xf32>
    %c0_26 = arith.constant 0 : index
    %c0_27 = arith.constant 0 : index
    %c0_28 = arith.constant 0 : index
    %65 = vector.load %arg2[%c0_26, %c0_27, %c0_28] : memref<4x1x1xf32, #tpu.memory_space<vmem>>, vector<4x1x1xf32>
    %c0_29 = arith.constant 0 : index
    %c0_30 = arith.constant 0 : index
    %c0_31 = arith.constant 0 : index
    %66 = vector.load %arg3[%c0_29, %c0_30, %c0_31] : memref<4x1x1xf32, #tpu.memory_space<vmem>>, vector<4x1x1xf32>
    %c0_32 = arith.constant 0 : index
    %c0_33 = arith.constant 0 : index
    %c0_34 = arith.constant 0 : index
    %67 = vector.load %arg4[%c0_32, %c0_33, %c0_34] : memref<4x1x1xf32, #tpu.memory_space<vmem>>, vector<4x1x1xf32>
    %cst_35 = arith.constant 9.99999974E-6 : f32
    %68 = vector.broadcast %cst_35 : f32 to vector<4x1x1xf32>
    %69 = arith.addf %27, %68 : vector<4x1x1xf32>
    %70 = math.rsqrt %69 : vector<4x1x1xf32>
    %cst_36 = arith.constant 9.99999974E-6 : f32
    %71 = vector.broadcast %cst_36 : f32 to vector<1x1x1xf32>
    %72 = arith.addf %60, %71 : vector<1x1x1xf32>
    %73 = math.rsqrt %72 : vector<1x1x1xf32>
    %74 = arith.mulf %65, %70 : vector<4x1x1xf32>
    %cst_37 = arith.constant 1.000000e+00 : f32
    %75 = vector.broadcast %cst_37 : f32 to vector<4x1x1xf32>
    %76 = arith.subf %75, %65 : vector<4x1x1xf32>
    %77 = vector.broadcast %73 : vector<1x1x1xf32> to vector<4x1x1xf32>
    %78 = arith.mulf %76, %77 : vector<4x1x1xf32>
    %79 = arith.addf %74, %78 : vector<4x1x1xf32>
    %80 = arith.mulf %66, %79 : vector<4x1x1xf32>
    %81 = arith.mulf %74, %16 : vector<4x1x1xf32>
    %82 = vector.broadcast %64 : vector<1x1x1xf32> to vector<4x1x1xf32>
    %83 = arith.mulf %78, %82 : vector<4x1x1xf32>
    %84 = arith.addf %81, %83 : vector<4x1x1xf32>
    %85 = arith.mulf %66, %84 : vector<4x1x1xf32>
    %86 = arith.subf %67, %85 : vector<4x1x1xf32>
    %87 = vector.broadcast %80 : vector<4x1x1xf32> to vector<4x16x16xf32>
    %88 = arith.mulf %1, %87 : vector<4x16x16xf32>
    %89 = vector.broadcast %86 : vector<4x1x1xf32> to vector<4x16x16xf32>
    %90 = arith.addf %88, %89 : vector<4x16x16xf32>
    %c0_38 = arith.constant 0 : index
    %c0_39 = arith.constant 0 : index
    %c0_40 = arith.constant 0 : index
    %c0_41 = arith.constant 0 : index
    %91 = vector.load %arg5[%c0_38, %c0_39, %c0_40, %c0_41] : memref<1x4x16x16xf32, #tpu.memory_space<vmem>>, vector<1x4x16x16xf32>
    %92 = vector.shape_cast %91 : vector<1x4x16x16xf32> to vector<4x16x16xf32>
    %93 = vector.shape_cast %90 : vector<4x16x16xf32> to vector<1x4x16x16xf32>
    tpu.vector_store %arg5[%c0_38, %c0_39, %c0_40, %c0_41], %93 {strides = array<i32>} : memref<1x4x16x16xf32, #tpu.memory_space<vmem>>, vector<1x4x16x16xf32>,
    return
  }
  func.func @transform_0(%arg0: i32) -> (i32, i32, i32, i32) {
    %c0_i32 = arith.constant 0 : i32
    %c0_i32_0 = arith.constant 0 : i32
    %c0_i32_1 = arith.constant 0 : i32
    %c0_i32_2 = arith.constant 0 : i32
    return %arg0, %c0_i32, %c0_i32_0, %c0_i32_1 : i32, i32, i32, i32
  }
  func.func @transform_1(%arg0: i32) -> (i32, i32, i32) {
    %c0_i32 = arith.constant 0 : i32
    %c0_i32_0 = arith.constant 0 : i32
    %c0_i32_1 = arith.constant 0 : i32
    %c0_i32_2 = arith.constant 0 : i32
    return %c0_i32, %c0_i32_0, %c0_i32_1 : i32, i32, i32
  }
  func.func @transform_2(%arg0: i32) -> (i32, i32, i32) {
    %c0_i32 = arith.constant 0 : i32
    %c0_i32_0 = arith.constant 0 : i32
    %c0_i32_1 = arith.constant 0 : i32
    %c0_i32_2 = arith.constant 0 : i32
    return %c0_i32, %c0_i32_0, %c0_i32_1 : i32, i32, i32
  }
  func.func @transform_3(%arg0: i32) -> (i32, i32, i32) {
    %c0_i32 = arith.constant 0 : i32
    %c0_i32_0 = arith.constant 0 : i32
    %c0_i32_1 = arith.constant 0 : i32
    %c0_i32_2 = arith.constant 0 : i32
    return %c0_i32, %c0_i32_0, %c0_i32_1 : i32, i32, i32
  }
  func.func @transform_4(%arg0: i32) -> (i32, i32, i32, i32) {
    %c0_i32 = arith.constant 0 : i32
    %c0_i32_0 = arith.constant 0 : i32
    %c0_i32_1 = arith.constant 0 : i32
    %c0_i32_2 = arith.constant 0 : i32
    return %arg0, %c0_i32, %c0_i32_0, %c0_i32_1 : i32, i32, i32, i32
  }
}

</mosaic_0001>

<bundles_post_ra>
// kernel: tpu_custom_call.1
= control target key start
LH: loop header
LB: loop body
LE: loop exit
PB: predicated region body
PF: predicated region fallthrough
CT: control target
= control target key end

     0   :  { %9 = vsyncpa [#allocation3], 0  ;;  %s1307_s0 = inlined_call_operand.hbm [shape: f32[2,4,16,16], index: 0, kind: input, shape index: {}]   ;;  %s1308_s1 = inlined_call_operand.vmem [shape: f32[4,1,1], index: 1, kind: input, shape index: {}]   ;;  %s1309_s2 = inlined_call_operand.vmem [shape: f32[4,1,1], index: 2, kind: input, shape index: {}]   ;;  %s1310_s3 = inlined_call_operand.vmem [shape: f32[4,1,1], index: 3, kind: input, shape index: {}]   ;;  %s1311_s4 = inlined_call_operand.hbm [shape: f32[2,4,16,16], index: 4, kind: output, shape index: {}]  }
   0x1   :  { %11 = vsyncpa [#allocation3 + $0x1], 0 }
   0x2   :  { %12 = vsyncpa [#allocation4], 0 }
   0x3   :  { %14 = vsyncpa [#allocation4 + $0x1], 0  ;;  %s933_s15 = smov 0   ;;  %s935_s16 = smov 0  }
   0x4   :  { %s937_s17 = smov 0   ;;  %s939_s18 = smov 0  }
   0x5 LB: > { %s954_s19 = sadd.s32 4294967295, %s901_s18   ;;  %s725_s20 = sadd.s32 4294967294, %s901_s18   ;;  %s901_s18 = sphi %s939_s18, %s1329_s18   ;;  %s897_s17 = sphi %s937_s17, %s1328_s17   ;;  %s893_s16 = sphi %s935_s16, %s1327_s16   ;;  %s889_s15 = sphi %s933_s15, %s1326_s15  }
   0x6   : > { %s958_s21 = sadd.s32 1, %s901_s18   ;;  %s27_s22 = sadd.s32 1, %s897_s17 }
   0x7   : > { %s24_s23 = ssub.s32 %s901_s18, %s958_s21  ;;  %p34_p0 = scmp.ne.s32.totalorder %s897_s17, %s893_s16 }
   0x8   : > { %p25_p1 = scmp.eq.s32.totalorder %s24_s23, 0  ;;  %p35_p2 = scmp.eq.s32.totalorder %s901_s18, 0 }
   0x9   : > { %p40_p3 = scmp.ne.s32.totalorder %s893_s16, %s889_s15  ;;  %p41_p4 = scmp.eq.s32.totalorder %s954_s19, 0 }
   0xa   : > { %s970_s24 = scalar_select %p25_p1, %s897_s17, %s27_s22  }
   0xb   : > { %p972_p5 = por %p35_p2, %p34_p0  ;;  %p976_p6 = por %p41_p4, %p40_p3 }
   0xc   : > { %p127_p7 = scmp.eq.s32.totalorder %s954_s19, 1  ;;  %p133_p8 = scmp.eq.s32.totalorder %s725_s20, 1 }
   0xd   : > { %p753_p10 = scmp.lt.s32.totalorder %s901_s18, 2  ;;  %s162_s29 = sand.u32 1, %s897_s17  }
   0xe   : > { %p983_p11 = por %p127_p7, %p34_p0  ;;  %p987_p12 = por %p133_p8, %p40_p3 }
   0xf   : > { %s739_s30 = sshll.u32 %s901_s18, 6  ;;  %s728_s5 = sshll.u32 %s162_s29, 6 }
  0x10   : > { %s171_s8 = scalar_lea.hbm %s1307_s0, %s739_s30  ;;  %s166_s10 = scalar_lea.vmem [#allocation2], %s728_s5 }
  0x11   : > { %s172_s9 = sshll.u32 %s171_s8, 4  ;;  %s174_s11 = sshll.u32 %s166_s10, 4  ;;  %s173_s9 = int_to_ptr.hbm [resolvable:$true] %s172_s9  ;;  %s175_s11 = int_to_ptr.vmem [resolvable:$true] %s174_s11 }
  0x12   : > { %p998_p13 = pnand %p753_p10, %p972_p5  ;;  %p731_p0 = scmp.ge.s32.totalorder %s901_s18, 1 }
  0x13   : > { %p182_p1 = scmp.lt.s32.totalorder %s901_s18, 3  ;;  %s163_s13 = scalar_lea.sflag [#allocation3], %s162_s29 }
  0x14   : > { %s805_s14 = sshra.s32 %s173_s9, 4  ;;  %p809_p3 = pneg %p998_p13  ;;  %s806_s14 = int_to_ptr.hbm [resolvable:$true] %s805_s14 }
  0x15   : > { %s807_s20 = scalar_lea.hbm %s806_s14, 64  ;;  %s812_s25 = scalar_lea.hbm %s1307_s0, 128 }
  0x16   : > { %p808_p2 = scmp.ne.s32.totalorder %s806_s14, %s807_s20  ;;  %p813_p5 = scmp.lt.s32.totalorder %s806_s14, %s1307_s0 }
  0x17   : > { %p814_p8 = scmp.lt.s32.totalorder %s812_s25, %s807_s20 }
  0x18   : > { %p810_p4 = pnand %p809_p3, %p808_p2 }
  0x19   : > { %p815_p10 = por %p814_p8, %p813_p5 }
  0x1a   : > { %p811_p7 = pneg %p810_p4 }
  0x1c   : > { %p816_p9 = pnand %p815_p10, %p811_p7 }
  0x1e   : > { %819 = shalt.err (!%p816_p9)
}
  0x1f   : > { %s903_s29 = smov 128   ;;  %s904_s6 = smov 8  }
  0x20   : > { %748 = dma.hbm_to_vmem [thread:$0]  (!%p998_p13), %s173_s9, 1024, %s175_s11, %s163_s13, %s903_s29, %s903_s29, %s904_s6  }
  0x21   : > { %p183_p2 = pnand %p731_p0, %p182_p1 }
  0x22   : > { %s1019_s7 = sand.u32 (!%p183_p2), 1, %s893_s16  }
  0x23   : > { %186 = sbr.rel (%p183_p2) target bundleno = 525 (0x20d), region = 36  ;;  %s732_s8 = sshll.u32 (!%p183_p2), %s1019_s7, 6 }
  0x24   : > { %s189_s10 = scalar_lea.sflag (!%p183_p2), [#allocation3], %s1019_s7  ;;  %s192_s14 = scalar_lea.vmem (!%p183_p2), [#allocation2], %s732_s8 }
  0x28   : > { %880 = dma.done.wait (%p976_p6), %s189_s10, 1024  }
  0x29   : > { %882 = vsyncadd (%p976_p6), %s189_s10, 4294966272  ;;  %vm226_vm0 = vcmask 130048   ;;  %v1029_v0 = vld [vmem:[%s192_s14] sm:$0xff]  ;;  %v1031_v1 = vld [vmem:[%s192_s14 + $0x8] sm:$0xff]  ;;  %s1249_s30 = scalar_lea.vmem [#allocation5], %s732_s8  ;;  %s740_s8 = sshll.u32 %s954_s19, 6 }
  0x2a   : > { %v1033_v2 = vld [vmem:[%s192_s14 + $0x20] sm:$0xff]  ;;  %v227_v3 = vsel %vm226_vm0, %v1029_v0, 0.0  ;;  %v228_v4 = vsel %vm226_vm0, %v1031_v1, 0.0  ;;  %v1039_v5 = vld [vmem:[%s192_s14 + $0x28] sm:$0xff]  ;;  %v1043_v7 = vld [vmem:[%s192_s14 + $0x10] sm:$0xff]  ;;  %s648_s6 = scalar_lea.hbm %s1311_s4, %s740_s8  ;;  %s649_s10 = sshll.u32 %s1249_s30, 4  ;;  %s650_s10 = int_to_ptr.vmem [resolvable:$true] %s649_s10 }
  0x2b   : > { %v245_v6 = vsel %vm226_vm0, %v1033_v2, 0.0  ;;  %v1045_v8 = vld [vmem:[%s192_s14 + $0x18] sm:$0xff]  ;;  %v229_v9 = vadd.f32 %v228_v4, %v227_v3  ;;  %v246_v10 = vsel %vm226_vm0, %v1039_v5, 0.0  ;;  %v236_v11 = vsel %vm226_vm0, %v1043_v7, 0.0  ;;  %v1053_v13 = vld [vmem:[%s192_s14 + $0x30] sm:$0xff]  ;;  %s637_s19 = scalar_lea.sflag [#allocation4], %s1019_s7 }
  0x2c   : > { %v237_v12 = vsel %vm226_vm0, %v1045_v8, 0.0  ;;  %v1055_v14 = vld [vmem:[%s192_s14 + $0x38] sm:$0xff]  ;;  %v247_v15 = vadd.f32 %v246_v10, %v245_v6  ;;  %v379_v17 = vadd.f32 %v236_v11, %v227_v3  ;;  %v254_v20 = vsel %vm226_vm0, %v1053_v13, 0.0  ;;  %s651_s14 = sshll.u32 %s648_s6, 4  ;;  %s855_s13 = scalar_lea.hbm %s1311_s4, 128  ;;  %s652_s14 = int_to_ptr.hbm [resolvable:$true] %s651_s14 }
  0x2d   : > { %v238_v16 = vadd.f32 %v237_v12, %v236_v11  ;;  %v382_v18 = vadd.f32 %v237_v12, %v228_v4  ;;  %v230_v19 = vrot.slane %v229_v9, 4  ;;  %v255_v21 = vsel %vm226_vm0, %v1055_v14, 0.0  ;;  %s849_s26 = sshra.s32 %s652_s14, 4  ;;  %s850_s26 = int_to_ptr.hbm [resolvable:$true] %s849_s26 }
  0x2e   : > { %v248_v22 = vrot.slane %v247_v15, 4  ;;  %v380_v24 = vadd.f32 %v379_v17, %v245_v6  ;;  %v256_v27 = vadd.f32 %v255_v21, %v254_v20  ;;  %s851_s9 = scalar_lea.hbm %s850_s26, 64  ;;  %p856_p0 = scmp.lt.s32.totalorder %s850_s26, %s1311_s4 }
  0x2f   : > { %v239_v23 = vrot.slane %v238_v16, 4  ;;  %v383_v25 = vadd.f32 %v382_v18, %v246_v10  ;;  %v231_v26 = vadd.f32 %v230_v19, %v229_v9  ;;  %p852_p6 = scmp.ne.s32.totalorder %s850_s26, %s851_s9  ;;  %p857_p1 = scmp.lt.s32.totalorder %s855_s13, %s851_s9 }
  0x30   : > { %v249_v28 = vadd.f32 %v248_v22, %v247_v15  ;;  %v381_v30 = vadd.f32 %v380_v24, %v254_v20  ;;  %v257_v33 = vrot.slane %v256_v27, 4 }
  0x31   : > { %v240_v29 = vadd.f32 %v239_v23, %v238_v16  ;;  %v384_v31 = vadd.f32 %v383_v25, %v255_v21  ;;  %v232_v32 = vrot.slane %v231_v26, 2  ;;  %p853_p9 = pnand %p852_p6, %p983_p11  ;;  %p858_p3 = por %p857_p1, %p856_p0 }
  0x32   : > { %v250_v34 = vrot.slane %v249_v28, 2  ;;  %v385_v36 = vmul.f32 0.25, %v381_v30  ;;  %v258_v39 = vadd.f32 %v257_v33, %v256_v27 }
  0x33   : > { %v241_v35 = vrot.slane %v240_v29, 2  ;;  %v386_v37 = vmul.f32 0.25, %v384_v31  ;;  %v233_v38 = vadd.f32 %v232_v32, %v231_v26  ;;  %p854_p13 = pneg %p853_p9 }
  0x34   : > { %v251_v40 = vadd.f32 %v250_v34, %v249_v28  ;;  %v387_v42 = vsub.f32 %v1029_v0, %v385_v36  ;;  %v259_v45 = vrot.slane %v258_v39, 2  ;;  %v389_v46 = vsub.f32 %v1043_v7, %v385_v36 }
  0x35   : > { %v242_v41 = vadd.f32 %v241_v35, %v240_v29  ;;  %v388_v43 = vsub.f32 %v1031_v1, %v386_v37  ;;  %v234_v44 = vrot.slane %v233_v38, 1  ;;  %v390_v47 = vsub.f32 %v1045_v8, %v386_v37  ;;  %p859_p4 = pnand %p858_p3, %p854_p13 }
  0x36   : > { %v252_v48 = vrot.slane %v251_v40, 1  ;;  %v391_v50 = vsub.f32 %v1033_v2, %v385_v36  ;;  %v392_v51 = vsub.f32 %v1039_v5, %v386_v37  ;;  %v260_v53 = vadd.f32 %v259_v45, %v258_v39 }
  0x37   : > { %v243_v49 = vrot.slane %v242_v41, 1  ;;  %v235_v52 = vadd.f32 %v234_v44, %v233_v38  ;;  %v393_v54 = vsub.f32 %v1053_v13, %v385_v36  ;;  %v394_v55 = vsub.f32 %v1055_v14, %v386_v37 }
  0x38   : > { %v253_v56 = vadd.f32 %v252_v48, %v251_v40  ;;  %v395_v58 = vmul.f32 %v387_v42, %v387_v42  ;;  %v396_v59 = vmul.f32 %v388_v43, %v388_v43  ;;  %v261_v61 = vrot.slane %v260_v53, 1 }
  0x39   : > { %v244_v57 = vadd.f32 %v243_v49, %v242_v41  ;;  %v1069_v60 = vmul.f32 0.0625, %v235_v52  ;;  %v397_v62 = vmul.f32 %v389_v46, %v389_v46  ;;  %v398_v63 = vmul.f32 %v390_v47, %v390_v47 }
  0x3a   : > { %v1071_v3 = vmul.f32 0.0625, %v253_v56  ;;  %v399_v6 = vmul.f32 %v391_v50, %v391_v50  ;;  %v400_v9 = vmul.f32 %v392_v51, %v392_v51  ;;  %v262_v12 = vadd.f32 %v261_v61, %v260_v53 }
  0x3b   : > { %v1073_v4 = vmul.f32 0.0625, %v244_v57  ;;  %v267_v10 = vsub.f32 %v1029_v0, %v1069_v60  ;;  %v268_v11 = vsub.f32 %v1031_v1, %v1069_v60  ;;  %v401_v15 = vmul.f32 %v393_v54, %v393_v54 }
  0x3c   : > { %v271_v16 = vsub.f32 %v1033_v2, %v1071_v3  ;;  %v272_v17 = vsub.f32 %v1039_v5, %v1071_v3  ;;  %v1087_v22 = vmul.f32 0.0625, %v262_v12  ;;  %v402_v23 = vmul.f32 %v394_v55, %v394_v55 }
  0x3d   : > { %v269_v18 = vsub.f32 %v1043_v7, %v1073_v4  ;;  %v270_v19 = vsub.f32 %v1045_v8, %v1073_v4  ;;  %v275_v20 = vmul.f32 %v267_v10, %v267_v10  ;;  %v276_v21 = vmul.f32 %v268_v11, %v268_v11 }
  0x3e   : > { %v279_v24 = vmul.f32 %v271_v16, %v271_v16  ;;  %v280_v25 = vmul.f32 %v272_v17, %v272_v17  ;;  %v273_v30 = vsub.f32 %v1053_v13, %v1087_v22  ;;  %v274_v31 = vsub.f32 %v1055_v14, %v1087_v22 }
  0x3f   : > { %v277_v26 = vmul.f32 %v269_v18, %v269_v18  ;;  %v278_v27 = vmul.f32 %v270_v19, %v270_v19  ;;  %v283_v28 = vsel %vm226_vm0, %v275_v20, 0.0  ;;  %v284_v29 = vsel %vm226_vm0, %v276_v21, 0.0 }
  0x40   : > { %v285_v32 = vadd.f32 %v284_v29, %v283_v28  ;;  %v301_v33 = vsel %vm226_vm0, %v279_v24, 0.0  ;;  %v302_v34 = vsel %vm226_vm0, %v280_v25, 0.0  ;;  %v281_v38 = vmul.f32 %v273_v30, %v273_v30 }
  0x41   : > { %v292_v35 = vsel %vm226_vm0, %v277_v26, 0.0  ;;  %v303_v36 = vadd.f32 %v302_v34, %v301_v33  ;;  %v293_v37 = vsel %vm226_vm0, %v278_v27, 0.0  ;;  %v282_v39 = vmul.f32 %v274_v31, %v274_v31 }
  0x42   : > { %v286_v40 = vrot.slane %v285_v32, 4  ;;  %v294_v41 = vadd.f32 %v293_v37, %v292_v35  ;;  %v403_v42 = vsel %vm226_vm0, %v395_v58, 0.0  ;;  %v404_v43 = vsel %vm226_vm0, %v397_v62, 0.0 }
  0x43   : > { %v304_v44 = vrot.slane %v303_v36, 4  ;;  %v310_v45 = vsel %vm226_vm0, %v281_v38, 0.0  ;;  %v311_v46 = vsel %vm226_vm0, %v282_v39, 0.0  ;;  %v405_v47 = vadd.f32 %v404_v43, %v403_v42 }
  0x44   : > { %v287_v48 = vadd.f32 %v286_v40, %v285_v32  ;;  %v295_v49 = vrot.slane %v294_v41, 4  ;;  %v312_v50 = vadd.f32 %v311_v46, %v310_v45  ;;  %v406_v51 = vsel %vm226_vm0, %v399_v6, 0.0 }
  0x45   : > { %v305_v52 = vadd.f32 %v304_v44, %v303_v36  ;;  %v407_v53 = vadd.f32 %v406_v51, %v405_v47  ;;  %v408_v54 = vsel %vm226_vm0, %v401_v15, 0.0  ;;  %v410_v55 = vsel %vm226_vm0, %v396_v59, 0.0 }
  0x46   : > { %v288_v56 = vrot.slane %v287_v48, 2  ;;  %v296_v57 = vadd.f32 %v295_v49, %v294_v41  ;;  %v313_v58 = vrot.slane %v312_v50, 4  ;;  %v411_v61 = vsel %vm226_vm0, %v398_v63, 0.0 }
  0x47   : > { %v306_v62 = vrot.slane %v305_v52, 2  ;;  %v409_v10 = vadd.f32 %v408_v54, %v407_v53  ;;  %v412_v11 = vadd.f32 %v411_v61, %v410_v55  ;;  %v413_v12 = vsel %vm226_vm0, %v400_v9, 0.0 }
  0x48   : > { %v289_v16 = vadd.f32 %v288_v56, %v287_v48  ;;  %v297_v17 = vrot.slane %v296_v57, 2  ;;  %v314_v18 = vadd.f32 %v313_v58, %v312_v50  ;;  %v415_v6 = vsel %vm226_vm0, %v402_v23, 0.0 }
  0x49   : > { %v307_v19 = vadd.f32 %v306_v62, %v305_v52  ;;  %v414_v20 = vadd.f32 %v413_v12, %v412_v11  ;;  %v417_v15 = vmul.f32 0.33333334, %v409_v10 }
  0x4a   : > { %v290_v21 = vrot.slane %v289_v16, 1  ;;  %v298_v59 = vadd.f32 %v297_v17, %v296_v57  ;;  %v315_v24 = vrot.slane %v314_v18, 2 }
  0x4b   : > { %v308_v25 = vrot.slane %v307_v19, 1  ;;  %v416_v26 = vadd.f32 %v415_v6, %v414_v20  ;;  %v419_v9 = vsel %vm226_vm0, %v417_v15, 0.0 }
  0x4c   : > { %v291_v27 = vadd.f32 %v290_v21, %v289_v16  ;;  %v299_v63 = vrot.slane %v298_v59, 1  ;;  %v316_v28 = vadd.f32 %v315_v24, %v314_v18 }
  0x4d   : > { %v309_v29 = vadd.f32 %v308_v25, %v307_v19  ;;  %v418_v30 = vmul.f32 0.33333334, %v416_v26 }
  0x4e   : > { %v319_v31 = vmul.f32 0.06666667, %v291_v27  ;;  %v300_v32 = vadd.f32 %v299_v63, %v298_v59  ;;  %v317_v33 = vrot.slane %v316_v28, 1 }
  0x4f   : > { %v321_v34 = vmul.f32 0.06666667, %v309_v29  ;;  %v420_v23 = vsel %vm226_vm0, %v418_v30, 0.0 }
  0x50   : > { %v339_v35 = vsel %vm226_vm0, %v319_v31, 0.0  ;;  %v318_v36 = vadd.f32 %v317_v33, %v316_v28  ;;  %v421_v37 = vadd.f32 %v420_v23, %v419_v9  ;;  %v320_v39 = vmul.f32 0.06666667, %v300_v32 }
  0x51   : > { %340 = vadd.xlane.f32.xlu0 %v339_v35  ;;  %v345_v38 = vsel %vm226_vm0, %v321_v34, 0.0  ;;  %v326_v23 = vsel %vm226_vm0, %v1073_v4, 0.0  ;;  %v332_v35 = vsel %vm226_vm0, %v1087_v22, 0.0 }
  0x52   : > { %346 = vadd.xlane.f32.xlu1 %v345_v38  ;;  %v422_v40 = vrot.slane %v421_v37, 4  ;;  %v322_v41 = vmul.f32 0.06666667, %v318_v36  ;;  %v342_v43 = vsel %vm226_vm0, %v320_v39, 0.0 }
  0x54   : > { %v423_v42 = vadd.f32 %v422_v40, %v421_v37  ;;  %v348_v45 = vsel %vm226_vm0, %v322_v41, 0.0  ;;  %v329_v40 = vsel %vm226_vm0, %v1071_v3, 0.0 }
  0x56   : > { %v424_v44 = vrot.slane %v423_v42, 2 }
  0x58   : > { %v425_v46 = vadd.f32 %v424_v44, %v423_v42 }
  0x59   : > { %343 = vadd.xlane.f32.xlu0 %v342_v43 }
  0x5a   : > { %349 = vadd.xlane.f32.xlu1 %v348_v45  ;;  %v426_v47 = vrot.slane %v425_v46, 1 }
  0x5c   : > { %v427_v48 = vadd.f32 %v426_v47, %v425_v46 }
  0x5e   : > { %v428_v49 = vmul.f32 0.0625, %v427_v48 }
  0x60   : > { %v429_v50 = vsub.f32 %v417_v15, %v428_v49  ;;  %v430_v51 = vsub.f32 %v418_v30, %v428_v49 }
  0x62   : > { %v431_v52 = vmul.f32 %v429_v50, %v429_v50  ;;  %v432_v53 = vmul.f32 %v430_v51, %v430_v51 }
  0x64   : > { %v433_v54 = vsel %vm226_vm0, %v431_v52, 0.0  ;;  %v434_v55 = vsel %vm226_vm0, %v432_v53, 0.0  ;;  %v905_v52 = vmov 0  }
  0x65   : > { %v435_v56 = vadd.f32 %v434_v55, %v433_v54  ;;  %794 = vset.pattern.permute.xlu1 %v905_v52  ;;  %793 = vset.pattern.permute.xlu0 %v905_v52 }
  0x66   : > { %792 = vset.pattern.permute.xlu2 %v905_v52 }
  0x67   : > { %v436_v57 = vrot.slane %v435_v56, 4 }
  0x69   : > { %v437_v58 = vadd.f32 %v436_v57, %v435_v56 }
  0x6b   : > { %v438_v61 = vrot.slane %v437_v58, 2 }
  0x6d   : > { %v439_v62 = vadd.f32 %v438_v61, %v437_v58 }
  0x6f   : > { %v440_v10 = vrot.slane %v439_v62, 1 }
  0x71   : > { %v441_v11 = vadd.f32 %v440_v10, %v439_v62 }
  0x73   : > { %v442_v12 = vmul.f32 0.06666667, %v441_v11 }
  0x75   : > { %v443_v16 = vsel %vm226_vm0, %v442_v12, 0.0 }
  0x76   : > { %444 = vadd.xlane.f32.xlu2 %v443_v16 }
  0xc4   : > { %v341_v17 = vpop.xlane.xlu0 %340 }
  0xc5   : > { %v351_v18 = vmul.f32 0.0625, %v341_v17  ;;  %v347_v6 = vpop.xlane.xlu1 %346 }
  0xc6   : > { %v353_v19 = vmul.f32 0.0625, %v347_v6 }
  0xc7   : > { %v355_v20 = vsub.f32 %v319_v31, %v351_v18  ;;  %v323_v31 = vsel %vm226_vm0, %v1069_v60, 0.0 }
  0xc8   : > { %v357_v15 = vsub.f32 %v321_v34, %v353_v19 }
  0xc9   : > { %v359_v21 = vmul.f32 %v355_v20, %v355_v20 }
  0xca   : > { %v361_v59 = vmul.f32 %v357_v15, %v357_v15 }
  0xcb   : > { %v363_v24 = vsel %vm226_vm0, %v359_v21, 0.0 }
  0xcc   : > { %364 = vadd.xlane.f32.xlu2 %v363_v24  ;;  %v344_v25 = vpop.xlane.xlu0 %343  ;;  %v369_v26 = vsel %vm226_vm0, %v361_v59, 0.0 }
  0xcd   : > { %v352_v27 = vmul.f32 0.0625, %v344_v25  ;;  %370 = vadd.xlane.f32.xlu1 %v369_v26  ;;  %v350_v63 = vpop.xlane.xlu1 %349 }
  0xce   : > { %v354_v28 = vmul.f32 0.0625, %v350_v63 }
  0xcf   : > { %v356_v29 = vsub.f32 %v320_v39, %v352_v27 }
  0xd0   : > { %v358_v30 = vsub.f32 %v322_v41, %v354_v28 }
  0xd1   : > { %v360_v9 = vmul.f32 %v356_v29, %v356_v29 }
  0xd2   : > { %v362_v32 = vmul.f32 %v358_v30, %v358_v30 }
  0xd3   : > { %v366_v33 = vsel %vm226_vm0, %v360_v9, 0.0 }
  0xd4   : > { %367 = vadd.xlane.f32.xlu0 %v366_v33  ;;  %v372_v34 = vsel %vm226_vm0, %v362_v32, 0.0 }
  0xd5   : > { %373 = vadd.xlane.f32.xlu2 %v372_v34  ;;  %324 = vadd.xlane.f32.xlu1 %v323_v31 }
  0xdd   : > { %327 = vadd.xlane.f32.xlu2 %v326_v23  ;;  %333 = vadd.xlane.f32.xlu1 %v332_v35 }
  0xe9   : > { %v445_v36 = vpop.xlane.xlu2 %444 }
  0xea   : > { %v446_v37 = vmul.f32 0.0625, %v445_v36 }
  0xec   : > { %v447_v38 = vsub.f32 %v442_v12, %v446_v37 }
  0xee   : > { %v448_v39 = vmul.f32 %v447_v38, %v447_v38 }
  0xf0   : > { %v449_v60 = vsel %vm226_vm0, %v448_v39, 0.0 }
  0xf1   : > { %450 = vadd.xlane.f32.xlu0 %v449_v60 }
  0xf9   : > { %330 = vadd.xlane.f32.xlu0 %v329_v40  ;;  %v457_v40 = vld [vmem:[%s1308_s1] sm:$0x1] }
 0x13f   : > { %v365_v41 = vpop.xlane.xlu2 %364 }
 0x140   : > { %v371_v43 = vpop.xlane.xlu1 %370  ;;  %v375_v4 = vmul.f32 0.06666667, %v365_v41 }
 0x141   : > { %v377_v45 = vmul.f32 0.06666667, %v371_v43 }
 0x142   : > { %v469_v46 = vadd.f32 1e-05, %v375_v4  ;;  %v458_v4 = vld [vmem:[%s1308_s1 + $0x1] sm:$0x1] }
 0x143   : > { %v471_v48 = vadd.f32 1e-05, %v377_v45 }
 0x144   : > { %795 = vrsqrt.f32 %v469_v46  ;;  %vm479_vm1 = vweird.f32 %v469_v46 }
 0x145   : > { %vm499_vm3 = vweird.f32 %v471_v48 }
 0x147   : > { %v368_v42 = vpop.xlane.xlu0 %367 }
 0x148   : > { %v376_v44 = vmul.f32 0.06666667, %v368_v42  ;;  %v374_v22 = vpop.xlane.xlu2 %373  ;;  %v325_v11 = vpop.xlane.xlu1 %324  ;;  %v528_v42 = vsub.f32 1.0, %v457_v40 }
 0x149   : > { %v378_v49 = vmul.f32 0.06666667, %v374_v22  ;;  %v1155_v21 = vmul.f32 0.0625, %v325_v11 }
 0x14a   : > { %v1131_v47 = vadd.f32 1e-05, %v376_v44  ;;  %v1136_v3 = vpop.eup %795  ;;  %v459_v44 = vld [vmem:[%s1308_s1 + $0x2] sm:$0x1] }
 0x14b   : > { %v1134_v50 = vadd.f32 1e-05, %v378_v49  ;;  %v474_v54 = vmul.f32 %v1136_v3, %v469_v46  ;;  %vm480_vm2 = vweird.f32 %v1136_v3  ;;  %v529_v46 = vsub.f32 1.0, %v458_v4 }
 0x14c   : > { %797 = vrsqrt.f32 %v1131_v47  ;;  %vm489_vm5 = vweird.f32 %v1131_v47  ;;  %vm1172_vm7 = vmor %vm479_vm1, %vm480_vm2 }
 0x14d   : > { %799 = vrsqrt.f32 %v471_v48  ;;  %v475_v62 = vmul.f32 %v1136_v3, %v474_v54  ;;  %vm509_vm9 = vweird.f32 %v1134_v50 }
 0x14e   : > { %801 = vrsqrt.f32 %v1134_v50 }
 0x14f   : > { %v476_v6 = vmul.f32 0.5, %v475_v62 }
 0x150   : > { %v328_v18 = vpop.xlane.xlu2 %327  ;;  %v334_v28 = vpop.xlane.xlu1 %333 }
 0x151   : > { %v1157_v59 = vmul.f32 0.0625, %v328_v18  ;;  %v477_v27 = vsub.f32 1.5, %v476_v6  ;;  %v1166_v34 = vmul.f32 0.0625, %v334_v28  ;;  %v461_v18 = vld [vmem:[%s1309_s2] sm:$0x1] }
 0x152   : > { %v1139_v51 = vpop.eup %797 }
 0x153   : > { %v1141_v53 = vpop.eup %799  ;;  %v484_v55 = vmul.f32 %v1139_v51, %v1131_v47  ;;  %v453_v25 = vadd.f32 %v1157_v59, %v1155_v21  ;;  %vm490_vm6 = vweird.f32 %v1139_v51  ;;  %v478_v23 = vmul.f32 %v1136_v3, %v477_v27 }
 0x154   : > { %v494_v56 = vmul.f32 %v1141_v53, %v471_v48  ;;  %v1147_v58 = vpop.eup %801  ;;  %vm500_vm4 = vweird.f32 %v1141_v53  ;;  %vm1186_vm11 = vmor %vm489_vm5, %vm490_vm6  ;;  %v530_v48 = vsub.f32 1.0, %v459_v44 }
 0x155   : > { %v485_v10 = vmul.f32 %v1139_v51, %v484_v55  ;;  %v504_v17 = vmul.f32 %v1147_v58, %v1134_v50  ;;  %vm1177_vm8 = vmor %vm499_vm3, %vm500_vm4  ;;  %vm510_vm10 = vweird.f32 %v1147_v58  ;;  %v482_v22 = vsel %vm1172_vm7, %v1136_v3, %v478_v23  ;;  %v460_v3 = vld [vmem:[%s1308_s1 + $0x3] sm:$0x1]  ;;  %v466_v23 = vld [vmem:[%s1310_s3 + $0x1] sm:$0x1] }
 0x156   : > { %v495_v16 = vmul.f32 %v1141_v53, %v494_v56  ;;  %vm1203_vm13 = vmor %vm509_vm9, %vm510_vm10  ;;  %v531_v55 = vsub.f32 1.0, %v460_v3 }
 0x157   : > { %v486_v19 = vmul.f32 0.5, %v485_v10  ;;  %v505_v15 = vmul.f32 %v1147_v58, %v504_v17  ;;  %v462_v17 = vld [vmem:[%s1309_s2 + $0x1] sm:$0x1] }
 0x158   : > { %v496_v20 = vmul.f32 0.5, %v495_v16  ;;  %v463_v16 = vld [vmem:[%s1309_s2 + $0x2] sm:$0x1] }
 0x159   : > { %v487_v63 = vsub.f32 1.5, %v486_v19  ;;  %v506_v30 = vmul.f32 0.5, %v505_v15 }
 0x15a   : > { %v497_v29 = vsub.f32 1.5, %v496_v20 }
 0x15b   : > { %v488_v35 = vmul.f32 %v1139_v51, %v487_v63  ;;  %v507_v37 = vsub.f32 1.5, %v506_v30 }
 0x15c   : > { %v498_v39 = vmul.f32 %v1141_v53, %v497_v29 }
 0x15d   : > { %v492_v47 = vsel %vm1186_vm11, %v1139_v51, %v488_v35  ;;  %v508_v54 = vmul.f32 %v1147_v58, %v507_v37  ;;  %v524_v51 = vmul.f32 %v482_v22, %v457_v40  ;;  %v465_v22 = vld [vmem:[%s1310_s3] sm:$0x1] }
 0x15e   : > { %v502_v52 = vsel %vm1177_vm8, %v1141_v53, %v498_v39 }
 0x15f   : > { %v526_v62 = vmul.f32 %v502_v52, %v459_v44  ;;  %v512_v53 = vsel %vm1203_vm13, %v1147_v58, %v508_v54 }
 0x160   : > { %v527_v58 = vmul.f32 %v512_v53, %v460_v3  ;;  %v467_v3 = vld [vmem:[%s1310_s3 + $0x2] sm:$0x1] }
 0x162   : > { %v547_v37 = vmul.f32 %v527_v58, %v1166_v34 }
 0x164   : > { %v451_v57 = vpop.xlane.xlu0 %450 }
 0x165   : > { %v452_v61 = vmul.f32 0.06666667, %v451_v57  ;;  %v525_v57 = vmul.f32 %v492_v47, %v458_v4 }
 0x167   : > { %v513_v12 = vadd.f32 1e-05, %v452_v61 }
 0x169   : > { %803 = vrsqrt.f32 %v513_v12  ;;  %vm520_vm14 = vweird.f32 %v513_v12 }
 0x16c   : > { %v331_v24 = vpop.xlane.xlu0 %330 }
 0x16d   : > { %v1161_v32 = vmul.f32 0.0625, %v331_v24  ;;  %v545_v24 = vmul.f32 %v525_v57, %v1157_v59  ;;  %v464_v59 = vld [vmem:[%s1309_s2 + $0x3] sm:$0x1] }
 0x16f   : > { %v804_v26 = vpop.eup %803  ;;  %v454_v33 = vadd.f32 %v453_v25, %v1161_v32 }
 0x170   : > { %v515_v9 = vmul.f32 %v804_v26, %v513_v12  ;;  %vm521_vm12 = vweird.f32 %v804_v26 }
 0x171   : > { %v455_v45 = vadd.f32 %v454_v33, %v1166_v34  ;;  %vm522_vm15 = vmor %vm520_vm14, %vm521_vm12  ;;  %v468_v34 = vld [vmem:[%s1310_s3 + $0x3] sm:$0x1] }
 0x172   : > { %v516_v31 = vmul.f32 %v804_v26, %v515_v9 }
 0x173   : > { %v456_v61 = vmul.f32 0.25, %v455_v45 }
 0x174   : > { %v517_v38 = vmul.f32 0.5, %v516_v31 }
 0x176   : > { %v518_v43 = vsub.f32 1.5, %v517_v38  ;;  %v544_v38 = vmul.f32 %v524_v51, %v1155_v21  ;;  %v546_v21 = vmul.f32 %v526_v62, %v1161_v32 }
 0x178   : > { %v519_v50 = vmul.f32 %v804_v26, %v518_v43 }
 0x17a   : > { %v523_v56 = vsel %vm522_vm15, %v804_v26, %v519_v50 }
 0x17b   : > { %v534_v10 = vmul.f32 %v530_v48, %v523_v56  ;;  %v533_v11 = vmul.f32 %v529_v46, %v523_v56  ;;  %v532_v12 = vmul.f32 %v528_v42, %v523_v56  ;;  %v535_v6 = vmul.f32 %v531_v55, %v523_v56 }
 0x17d   : > { %v538_v19 = vadd.f32 %v534_v10, %v526_v62  ;;  %v537_v20 = vadd.f32 %v533_v11, %v525_v57  ;;  %v536_v15 = vadd.f32 %v532_v12, %v524_v51  ;;  %v549_v25 = vmul.f32 %v533_v11, %v456_v61 }
 0x17e   : > { %v551_v29 = vmul.f32 %v535_v6, %v456_v61  ;;  %v539_v33 = vadd.f32 %v535_v6, %v527_v58  ;;  %v548_v36 = vmul.f32 %v532_v12, %v456_v61  ;;  %v550_v45 = vmul.f32 %v534_v10, %v456_v61 }
 0x17f   : > { %v542_v26 = vmul.f32 %v538_v19, %v463_v16  ;;  %v541_v27 = vmul.f32 %v537_v20, %v462_v17  ;;  %v540_v63 = vmul.f32 %v536_v15, %v461_v18  ;;  %v553_v28 = vadd.f32 %v549_v25, %v545_v24 }
 0x180   : > { %v555_v39 = vadd.f32 %v551_v29, %v547_v37  ;;  %v543_v40 = vmul.f32 %v539_v33, %v464_v59  ;;  %v552_v41 = vadd.f32 %v548_v36, %v544_v38  ;;  %v554_v48 = vadd.f32 %v550_v45, %v546_v21 }
 0x181   : > { %v570_v30 = vperm.slane %v542_v26, 0  ;;  %v569_v9 = vperm.slane %v541_v27, 0  ;;  %v568_v31 = vperm.slane %v540_v63, 0  ;;  %v557_v35 = vmul.f32 %v553_v28, %v462_v17 }
 0x182   : > { %v559_v43 = vmul.f32 %v555_v39, %v464_v59  ;;  %v571_v4 = vperm.slane %v543_v40, 0  ;;  %v556_v44 = vmul.f32 %v552_v41, %v461_v18  ;;  %v558_v52 = vmul.f32 %v554_v48, %v463_v16 }
 0x183   : > { %581 = vperm.xlu1 %794, %v570_v30   ;;  %577 = vperm.xlu0 %793, %v569_v9   ;;  %v561_v60 = vsub.f32 %v466_v23, %v557_v35 }
 0x184   : > { %573 = vperm.xlu2 %792, %v568_v31   ;;  %v563_v46 = vsub.f32 %v468_v34, %v559_v43  ;;  %v560_v47 = vsub.f32 %v465_v22, %v556_v44  ;;  %v562_v54 = vsub.f32 %v467_v3, %v558_v52 }
 0x185   : > { %v601_v42 = vperm.slane %v561_v60, 0 }
 0x186   : > { %v603_v49 = vperm.slane %v563_v46, 0  ;;  %v600_v50 = vperm.slane %v560_v47, 0  ;;  %v602_v55 = vperm.slane %v562_v54, 0 }
 0x18b   : > { %609 = vperm.xlu1 %794, %v601_v42  }
 0x18c   : > { %585 = vperm.xlu2 %792, %v571_v4  }
 0x193   : > { %617 = vperm.xlu1 %794, %v603_v49  }
 0x194   : > { %605 = vperm.xlu2 %792, %v600_v50  }
 0x19c   : > { %613 = vperm.xlu2 %792, %v602_v55  }
 0x1de   : > { %v574_v51 = vpop.permute.xlu2 %573 }
 0x1df   : > { %v588_v32 = vmul.f32 %v574_v51, %v1029_v0  ;;  %v589_v57 = vmul.f32 %v574_v51, %v1031_v1 }
 0x1e6   : > { %v586_v56 = vpop.permute.xlu2 %585 }
 0x1ee   : > { %v606_v61 = vpop.permute.xlu2 %605 }
 0x1ef   : > { %v620_v62 = vadd.f32 %v606_v61, %v588_v32  ;;  %v621_v10 = vadd.f32 %v606_v61, %v589_v57 }
 0x1f1   : > { %628 = vst.msk [vmem:[%s1249_s30] sm:$0xff] %vm226_vm0, %v620_v62 }
 0x1f2   : > { %629 = vst.msk [vmem:[%s1249_s30 + $0x8] sm:$0xff] %vm226_vm0, %v621_v10 }
 0x1f5   : > { %v582_v11 = vpop.permute.xlu1 %581  ;;  %v578_v17 = vpop.permute.xlu0 %577 }
 0x1f6   : > { %v592_v0 = vmul.f32 %v582_v11, %v1033_v2  ;;  %v593_v1 = vmul.f32 %v582_v11, %v1039_v5  ;;  %v614_v12 = vpop.permute.xlu2 %613  ;;  %v590_v18 = vmul.f32 %v578_v17, %v1043_v7  ;;  %v591_v6 = vmul.f32 %v578_v17, %v1045_v8 }
 0x1f7   : > { %v594_v7 = vmul.f32 %v586_v56, %v1053_v13  ;;  %v595_v8 = vmul.f32 %v586_v56, %v1055_v14 }
 0x1f8   : > { %v624_v53 = vadd.f32 %v614_v12, %v592_v0  ;;  %v625_v16 = vadd.f32 %v614_v12, %v593_v1 }
 0x1fa   : > { %632 = vst.msk [vmem:[%s1249_s30 + $0x20] sm:$0xff] %vm226_vm0, %v624_v53 }
 0x1fb   : > { %633 = vst.msk [vmem:[%s1249_s30 + $0x28] sm:$0xff] %vm226_vm0, %v625_v16 }
 0x1fd   : > { %v610_v19 = vpop.permute.xlu1 %609 }
 0x1fe   : > { %v622_v2 = vadd.f32 %v610_v19, %v590_v18  ;;  %v623_v5 = vadd.f32 %v610_v19, %v591_v6 }
 0x200   : > { %630 = vst.msk [vmem:[%s1249_s30 + $0x10] sm:$0xff] %vm226_vm0, %v622_v2 }
 0x201   : > { %631 = vst.msk [vmem:[%s1249_s30 + $0x18] sm:$0xff] %vm226_vm0, %v623_v5 }
 0x205   : > { %v618_v20 = vpop.permute.xlu1 %617 }
 0x206   : > { %v626_v15 = vadd.f32 %v618_v20, %v594_v7  ;;  %v627_v24 = vadd.f32 %v618_v20, %v595_v8 }
 0x208   : > { %634 = vst.msk [vmem:[%s1249_s30 + $0x30] sm:$0xff] %vm226_vm0, %v626_v15 }
 0x209   : > { %635 = vst.msk [vmem:[%s1249_s30 + $0x38] sm:$0xff] %vm226_vm0, %v627_v24 }
 0x20a   : > { %862 = shalt.err (!%p859_p4)
}
 0x20b   : > { %s906_s7 = smov 128   ;;  %s907_s23 = smov 8  }
 0x20c   : > { %743 = dma.vmem_to_hbm [thread:$0]  (%p983_p11), %s650_s10, 1024, %s652_s14, %s637_s19, %s906_s7, %s906_s7, %s907_s23  }
 0x20d PF: > { %s666_s25 = sand.u32 1, %s889_s15   ;;  %p1325_p7 = scmp.ge.s32.totalorder %s901_s18, 2 }
 0x20e   : > { %s667_s30 = scalar_lea.sflag [#allocation4], %s666_s25 }
 0x20f   : > { %p750_p5 = pnand %p1325_p7, %p987_p12 }
 0x211   : > { %p751_p8 = pneg %p750_p5 }
 0x213   : > { %884 = dma.done.wait (%p751_p8), %s667_s30, 1024  }
 0x214   : > { %886 = vsyncadd (%p751_p8), %s667_s30, 4294966272  ;;  %p17_p10 = scmp.ge.s32.totalorder %s958_s21, 4   ;;  %s1326_s15 = smov %s893_s16 }
 0x215   : > { %s1327_s16 = smov %s897_s17  ;;  %s1328_s17 = smov %s970_s24 }
 0x216   : > { %s1329_s18 = smov %s958_s21  ;;  %19 = sbr.rel (!%p17_p10) target bundleno = 5 (0x5), region = 81 }
 0x21b   :  { %673 = vsyncpa [#allocation3], 1 }
 0x21c   :  { %675 = vsyncpa [#allocation3 + $0x1], 1 }
 0x21d   :  { %676 = vsyncpa [#allocation4], 1 }
 0x21e   :  { %678 = vsyncpa [#allocation4 + $0x1], 1 }

</bundles_post_ra>
